<compile_context>
chip_gen: v7x
topology: tpu7x:2x2x1
jax: 0.10.0
libtpu: 0.0.40
codegen_flags: <defaults>
</compile_context>

<pallas_src>
import functools

import jax
import jax.numpy as jnp
from jax.experimental import pallas as pl
from jax.experimental.pallas import tpu as pltpu

# ---- Small, deterministic config consistent with the module ----
NUM_USERS = 64
NUM_ITEMS = 96
NUM_TOTAL = NUM_USERS + NUM_ITEMS      # rows of the fused embedding table
EMB = 32                               # embedding_size
NUM_LAYERS = 3                         # num_layers
CAT = EMB * (NUM_LAYERS + 1)           # 128 == exactly one lane-vreg width
BATCH = 256                            # (user, pos item, neg item) triples
BATCH_BLOCK = 128                      # batch rows per grid step (>=2 grid steps)


def ngcf_kernel(uidx_ref, iidx_ref, nidx_ref,        # (1, bb) int32 index rows
                tab_ref,                              # (EMB, NUM_TOTAL) fused table^T
                wl_ref, bl_ref,                       # (L, EMB, EMB), (L, EMB, 1)
                wfin_ref, bfin_ref,                   # (2*EMB, CAT), (2*EMB, 1)
                out_ref,                              # (2, bb) scores, batch on lanes
                *, bb, num_layers, emb):
    """One batch block of the NGCF forward pass (eval mode), transposed layout.

    Everything is kept feature-major (features on sublanes, batch on lanes), so
    all intermediates and the output are lane-dense and no transposes are needed.
    """
    # ---- 1. Vectorized embedding gather: one one-hot + one MXU dot ----------
    # idx_row: [user | pos-item | neg-item] indices, items pre-offset by
    # NUM_USERS in the wrapper so they address the fused embedding table.
    idx_row = jnp.concatenate([uidx_ref[...], iidx_ref[...], nidx_ref[...]],
                              axis=1)                                   # (1, 3*bb)
    onehot = (jax.lax.broadcasted_iota(jnp.int32, (NUM_TOTAL, 3 * bb), 0)
              == idx_row).astype(jnp.float32)                           # (NUM_TOTAL, 3*bb)
    gathered = jnp.dot(tab_ref[...], onehot,
                       preferred_element_type=jnp.float32)              # (EMB, 3*bb)
    x = gathered[:, :2 * bb]        # cols [0:bb] = users, [bb:2bb] = pos items
    neg = gathered[:, 2 * bb:]      # raw negative-item embeddings

    # TODO(synk): F.dropout(p1=0.1) is identity in eval mode; training-mode
    # stochastic dropout (pltpu.prng_random_bits masking) intentionally omitted.

    # ---- 2. Graph-conv layers on the stacked (EMB, 2*bb) activation slab ----
    parts = [x]
    for layer in range(num_layers):
        w = wl_ref[layer]           # (EMB, EMB), torch (out, in) orientation
        b = bl_ref[layer]           # (EMB, 1), broadcast over lanes
        x = jnp.maximum(jnp.dot(w, x, preferred_element_type=jnp.float32) + b, 0.0)
        parts.append(x)

    # ---- 3. Final projections: sublane concat + single K=CAT(=128) dot ------
    x_cat = jnp.concatenate(parts, axis=0)                              # (CAT, 2*bb)
    fin = jnp.dot(wfin_ref[...], x_cat,
                  preferred_element_type=jnp.float32) + bfin_ref[...]   # (2*EMB, 2*bb)
    u_fin = fin[:emb, :bb]          # final_user_linear(user rows)
    i_fin = fin[emb:, bb:]          # final_item_linear(item rows)

    # ---- 4. In-kernel reduce; lane-dense (2, bb) score store ----------------
    # p2 == 0.0 in the reference, so the final dropout is a no-op.
    pos_scores = jnp.sum(u_fin * i_fin, axis=0, keepdims=True)          # (1, bb)
    neg_scores = jnp.sum(u_fin * neg, axis=0, keepdims=True)            # (1, bb)
    out_ref[...] = jnp.concatenate([pos_scores, neg_scores], axis=0)    # (2, bb)


def prepare_kernel_params(params):
    """One-time packing of parameters into the transposed kernel layout."""
    table_t = jnp.concatenate([params["user_table"], params["item_table"]],
                              axis=0).T                                  # (EMB, NUM_TOTAL)
    wl_t = jnp.transpose(params["wl"], (0, 2, 1))                        # (L, out, in)
    bl_t = jnp.transpose(params["bl"], (0, 2, 1))                        # (L, EMB, 1)
    w_fin = jnp.concatenate([params["wu"].T, params["wi"].T], axis=0)    # (2*EMB, CAT)
    b_fin = jnp.concatenate([params["bu"], params["bi"]], axis=-1).T     # (2*EMB, 1)
    return dict(table_t=table_t, wl=wl_t, bl=bl_t, w_fin=w_fin, b_fin=b_fin)


@functools.partial(jax.jit, static_argnames=("batch_block",))
def ngcf_forward(kparams, user_idx, item_idx, neg_idx, batch_block=BATCH_BLOCK):
    B = user_idx.shape[0]
    bb = min(batch_block, B)
    assert B % bb == 0, "batch must be divisible by the batch block"
    nblk = B // bb
    L = NUM_LAYERS

    # Lane-major index rows; item/neg offset into the fused embedding table.
    uidx = user_idx.astype(jnp.int32).reshape(1, B)
    iidx = (item_idx.astype(jnp.int32) + NUM_USERS).reshape(1, B)
    nidx = (neg_idx.astype(jnp.int32) + NUM_USERS).reshape(1, B)

    grid_spec = pltpu.PrefetchScalarGridSpec(
        num_scalar_prefetch=0,
        grid=(nblk,),
        in_specs=[
            pl.BlockSpec((1, bb), lambda g: (0, g)),            # user indices
            pl.BlockSpec((1, bb), lambda g: (0, g)),            # pos-item indices
            pl.BlockSpec((1, bb), lambda g: (0, g)),            # neg-item indices
            # Grid-invariant operands (constant index_map: Pallas skips re-DMA;
            # their double-buffer footprint is ~50 KB, so no Buffered(1) needed).
            pl.BlockSpec((EMB, NUM_TOTAL), lambda g: (0, 0)),
            pl.BlockSpec((L, EMB, EMB), lambda g: (0, 0, 0)),
            pl.BlockSpec((L, EMB, 1), lambda g: (0, 0, 0)),
            pl.BlockSpec((2 * EMB, CAT), lambda g: (0, 0)),
            pl.BlockSpec((2 * EMB, 1), lambda g: (0, 0)),
        ],
        out_specs=pl.BlockSpec((2, bb), lambda g: (0, g)),
    )

    kernel = functools.partial(ngcf_kernel, bb=bb, num_layers=L, emb=EMB)
    scores = pl.pallas_call(
        kernel,
        grid_spec=grid_spec,
        out_shape=jax.ShapeDtypeStruct((2, B), jnp.float32),
        compiler_params=pltpu.CompilerParams(
            dimension_semantics=("parallel",)),      # batch blocks shard across TCs
    )(uidx, iidx, nidx,
      kparams["table_t"], kparams["wl"], kparams["bl"],
      kparams["w_fin"], kparams["b_fin"])

    return scores[0], scores[1]


def ngcf_reference(params, user_idx, item_idx, neg_idx):
    """Pure-JAX reference mirroring the PyTorch forward (eval mode)."""
    u = params["user_table"][user_idx]
    i = params["item_table"][item_idx]
    n = params["item_table"][neg_idx]
    u_parts, i_parts = [u], [i]
    for layer in range(NUM_LAYERS):
        W = params["wl"][layer]
        b = params["bl"][layer]
        u = jnp.maximum(u @ W + b, 0.0)
        i = jnp.maximum(i @ W + b, 0.0)
        u_parts.append(u)
        i_parts.append(i)
    u_cat = jnp.concatenate(u_parts, -1)
    i_cat = jnp.concatenate(i_parts, -1)
    u_fin = u_cat @ params["wu"] + params["bu"]
    i_fin = i_cat @ params["wi"] + params["bi"]
    return jnp.sum(u_fin * i_fin, -1), jnp.sum(u_fin * n, -1)


def xavier_uniform(key, fan_in, fan_out):
    bound = (6.0 / (fan_in + fan_out)) ** 0.5
    # PyTorch weight shape is (fan_out, fan_in); we store the transpose (fan_in, fan_out).
    return jax.random.uniform(key, (fan_in, fan_out), dtype=jnp.float32,
                              minval=-bound, maxval=bound)


def init_params(key):
    keys = jax.random.split(key, 2 + NUM_LAYERS + 2)
    # nn.Embedding default init: N(0, 1)
    user_table = jax.random.normal(keys[0], (NUM_USERS, EMB), dtype=jnp.float32)
    item_table = jax.random.normal(keys[1], (NUM_ITEMS, EMB), dtype=jnp.float32)
    # Per-layer linear weights (xavier uniform), biases zero.
    wl = jnp.stack([xavier_uniform(keys[2 + l], EMB, EMB) for l in range(NUM_LAYERS)])
    bl = jnp.zeros((NUM_LAYERS, 1, EMB), dtype=jnp.float32)
    # Final projections: in = EMB*(L+1), out = EMB.
    wu = xavier_uniform(keys[2 + NUM_LAYERS], CAT, EMB)
    wi = xavier_uniform(keys[3 + NUM_LAYERS], CAT, EMB)
    bu = jnp.zeros((1, EMB), dtype=jnp.float32)
    bi = jnp.zeros((1, EMB), dtype=jnp.float32)
    return dict(user_table=user_table, item_table=item_table,
                wl=wl, bl=bl, wu=wu, bu=bu, wi=wi, bi=bi)


if __name__ == "__main__":
    key = jax.random.PRNGKey(0)
    pkey, ukey, ikey, nkey = jax.random.split(key, 4)

    params = init_params(pkey)
    kparams = prepare_kernel_params(params)
    user_idx = jax.random.randint(ukey, (BATCH,), 0, NUM_USERS, dtype=jnp.int32)
    item_idx = jax.random.randint(ikey, (BATCH,), 0, NUM_ITEMS, dtype=jnp.int32)
    neg_idx = jax.random.randint(nkey, (BATCH,), 0, NUM_ITEMS, dtype=jnp.int32)

    pos, neg = ngcf_forward(kparams, user_idx, item_idx, neg_idx)
    jax.block_until_ready((pos, neg))

    ref_pos, ref_neg = ngcf_reference(params, user_idx, item_idx, neg_idx)
    assert jnp.allclose(pos, ref_pos, atol=1e-3, rtol=1e-3), (pos, ref_pos)
    assert jnp.allclose(neg, ref_neg, atol=1e-3, rtol=1e-3), (neg, ref_neg)

    print("KERNEL_OK")
</pallas_src>

<mosaic_0001>
module attributes {stable_mosaic.version = 11 : i64} {
  func.func @ngcf_kernel(%arg0: i32, %arg1: memref<1x128xi32, #tpu.memory_space<vmem>>, %arg2: memref<1x128xi32, #tpu.memory_space<vmem>>, %arg3: memref<1x128xi32, #tpu.memory_space<vmem>>, %arg4: memref<32x160xf32, #tpu.memory_space<vmem>>, %arg5: memref<3x32x32xf32, #tpu.memory_space<vmem>>, %arg6: memref<3x32x1xf32, #tpu.memory_space<vmem>>, %arg7: memref<64x128xf32, #tpu.memory_space<vmem>>, %arg8: memref<64x1xf32, #tpu.memory_space<vmem>>, %arg9: memref<2x128xf32, #tpu.memory_space<vmem>>) attributes {dimension_semantics = [#tpu.dimension_semantics<parallel>], iteration_bounds = array<i64: 2>, scalar_prefetch = 0 : i64, scratch_operands = 0 : i64, tpu.core_type = #tpu.core_type<tc>, window_params = [{transform_indices = @transform_0, window_bounds = array<i64: 1, 128>}, {transform_indices = @transform_1, window_bounds = array<i64: 1, 128>}, {transform_indices = @transform_2, window_bounds = array<i64: 1, 128>}, {pipeline_mode = #tpu.pipeline_mode<synchronous>, transform_indices = @transform_3, window_bounds = array<i64: 32, 160>}, {pipeline_mode = #tpu.pipeline_mode<synchronous>, transform_indices = @transform_4, window_bounds = array<i64: 3, 32, 32>}, {pipeline_mode = #tpu.pipeline_mode<synchronous>, transform_indices = @transform_5, window_bounds = array<i64: 3, 32, 1>}, {pipeline_mode = #tpu.pipeline_mode<synchronous>, transform_indices = @transform_6, window_bounds = array<i64: 64, 128>}, {pipeline_mode = #tpu.pipeline_mode<synchronous>, transform_indices = @transform_7, window_bounds = array<i64: 64, 1>}, {transform_indices = @transform_8, window_bounds = array<i64: 2, 128>}]} {
    %c0 = arith.constant 0 : index
    %c0_0 = arith.constant 0 : index
    %0 = vector.load %arg1[%c0, %c0_0] : memref<1x128xi32, #tpu.memory_space<vmem>>, vector<1x128xi32>
    %c0_1 = arith.constant 0 : index
    %c0_2 = arith.constant 0 : index
    %1 = vector.load %arg2[%c0_1, %c0_2] : memref<1x128xi32, #tpu.memory_space<vmem>>, vector<1x128xi32>
    %c0_3 = arith.constant 0 : index
    %c0_4 = arith.constant 0 : index
    %2 = vector.load %arg3[%c0_3, %c0_4] : memref<1x128xi32, #tpu.memory_space<vmem>>, vector<1x128xi32>
    %3 = tpu.concatenate %0, %1, %2 in 1 : vector<1x128xi32>, vector<1x128xi32>, vector<1x128xi32> -> vector<1x384xi32>
    %4 = tpu.iota {dimensions = array<i32: 0>} : vector<160x384xi32>
    %5 = vector.broadcast %3 : vector<1x384xi32> to vector<160x384xi32>
    %6 = arith.cmpi eq, %4, %5 : vector<160x384xi32>
    %7 = arith.extui %6 : vector<160x384xi1> to vector<160x384xi32>
    %8 = arith.sitofp %7 : vector<160x384xi32> to vector<160x384xf32>
    %c0_5 = arith.constant 0 : index
    %c0_6 = arith.constant 0 : index
    %9 = vector.load %arg4[%c0_5, %c0_6] : memref<32x160xf32, #tpu.memory_space<vmem>>, vector<32x160xf32>
    %cst = arith.constant dense<0.000000e+00> : vector<32x384xf32>
    %10 = tpu.matmul %9, %8, %cst {dimension_numbers = #tpu.dot_dimension_numbers<[1], [0], [0], [1], [0, 0, 1, 1], [], []>} : vector<32x160xf32>, vector<160x384xf32>, vector<32x384xf32> -> vector<32x384xf32>
    %11 = vector.extract_strided_slice %10 {offsets = [0, 0], sizes = [32, 256], strides = [1, 1]} : vector<32x384xf32> to vector<32x256xf32>
    %12 = vector.extract_strided_slice %10 {offsets = [0, 256], sizes = [32, 128], strides = [1, 1]} : vector<32x384xf32> to vector<32x128xf32>
    %c0_7 = arith.constant 0 : index
    %c0_8 = arith.constant 0 : index
    %c0_9 = arith.constant 0 : index
    %13 = vector.load %arg5[%c0_7, %c0_8, %c0_9] : memref<3x32x32xf32, #tpu.memory_space<vmem>>, vector<1x32x32xf32>
    %14 = vector.shape_cast %13 : vector<1x32x32xf32> to vector<32x32xf32>
    %c0_10 = arith.constant 0 : index
    %c0_11 = arith.constant 0 : index
    %c0_12 = arith.constant 0 : index
    %15 = vector.load %arg6[%c0_10, %c0_11, %c0_12] : memref<3x32x1xf32, #tpu.memory_space<vmem>>, vector<1x32x1xf32>
    %16 = vector.shape_cast %15 : vector<1x32x1xf32> to vector<32x1xf32>
    %cst_13 = arith.constant dense<0.000000e+00> : vector<32x256xf32>
    %17 = tpu.matmul %14, %11, %cst_13 {dimension_numbers = #tpu.dot_dimension_numbers<[1], [0], [0], [1], [0, 0, 1, 1], [], []>} : vector<32x32xf32>, vector<32x256xf32>, vector<32x256xf32> -> vector<32x256xf32>
    %18 = vector.broadcast %16 : vector<32x1xf32> to vector<32x256xf32>
    %19 = arith.addf %17, %18 : vector<32x256xf32>
    %cst_14 = arith.constant 0.000000e+00 : f32
    %20 = vector.broadcast %cst_14 : f32 to vector<32x256xf32>
    %21 = arith.maximumf %19, %20 : vector<32x256xf32>
    %c1 = arith.constant 1 : index
    %c0_15 = arith.constant 0 : index
    %c0_16 = arith.constant 0 : index
    %22 = vector.load %arg5[%c1, %c0_15, %c0_16] : memref<3x32x32xf32, #tpu.memory_space<vmem>>, vector<1x32x32xf32>
    %23 = vector.shape_cast %22 : vector<1x32x32xf32> to vector<32x32xf32>
    %c1_17 = arith.constant 1 : index
    %c0_18 = arith.constant 0 : index
    %c0_19 = arith.constant 0 : index
    %24 = vector.load %arg6[%c1_17, %c0_18, %c0_19] : memref<3x32x1xf32, #tpu.memory_space<vmem>>, vector<1x32x1xf32>
    %25 = vector.shape_cast %24 : vector<1x32x1xf32> to vector<32x1xf32>
    %cst_20 = arith.constant dense<0.000000e+00> : vector<32x256xf32>
    %26 = tpu.matmul %23, %21, %cst_20 {dimension_numbers = #tpu.dot_dimension_numbers<[1], [0], [0], [1], [0, 0, 1, 1], [], []>} : vector<32x32xf32>, vector<32x256xf32>, vector<32x256xf32> -> vector<32x256xf32>
    %27 = vector.broadcast %25 : vector<32x1xf32> to vector<32x256xf32>
    %28 = arith.addf %26, %27 : vector<32x256xf32>
    %cst_21 = arith.constant 0.000000e+00 : f32
    %29 = vector.broadcast %cst_21 : f32 to vector<32x256xf32>
    %30 = arith.maximumf %28, %29 : vector<32x256xf32>
    %c2 = arith.constant 2 : index
    %c0_22 = arith.constant 0 : index
    %c0_23 = arith.constant 0 : index
    %31 = vector.load %arg5[%c2, %c0_22, %c0_23] : memref<3x32x32xf32, #tpu.memory_space<vmem>>, vector<1x32x32xf32>
    %32 = vector.shape_cast %31 : vector<1x32x32xf32> to vector<32x32xf32>
    %c2_24 = arith.constant 2 : index
    %c0_25 = arith.constant 0 : index
    %c0_26 = arith.constant 0 : index
    %33 = vector.load %arg6[%c2_24, %c0_25, %c0_26] : memref<3x32x1xf32, #tpu.memory_space<vmem>>, vector<1x32x1xf32>
    %34 = vector.shape_cast %33 : vector<1x32x1xf32> to vector<32x1xf32>
    %cst_27 = arith.constant dense<0.000000e+00> : vector<32x256xf32>
    %35 = tpu.matmul %32, %30, %cst_27 {dimension_numbers = #tpu.dot_dimension_numbers<[1], [0], [0], [1], [0, 0, 1, 1], [], []>} : vector<32x32xf32>, vector<32x256xf32>, vector<32x256xf32> -> vector<32x256xf32>
    %36 = vector.broadcast %34 : vector<32x1xf32> to vector<32x256xf32>
    %37 = arith.addf %35, %36 : vector<32x256xf32>
    %cst_28 = arith.constant 0.000000e+00 : f32
    %38 = vector.broadcast %cst_28 : f32 to vector<32x256xf32>
    %39 = arith.maximumf %37, %38 : vector<32x256xf32>
    %40 = tpu.concatenate %11, %21, %30, %39 in 0 : vector<32x256xf32>, vector<32x256xf32>, vector<32x256xf32>, vector<32x256xf32> -> vector<128x256xf32>
    %c0_29 = arith.constant 0 : index
    %c0_30 = arith.constant 0 : index
    %41 = vector.load %arg7[%c0_29, %c0_30] : memref<64x128xf32, #tpu.memory_space<vmem>>, vector<64x128xf32>
    %cst_31 = arith.constant dense<0.000000e+00> : vector<64x256xf32>
    %42 = tpu.matmul %41, %40, %cst_31 {dimension_numbers = #tpu.dot_dimension_numbers<[1], [0], [0], [1], [0, 0, 1, 1], [], []>} : vector<64x128xf32>, vector<128x256xf32>, vector<64x256xf32> -> vector<64x256xf32>
    %c0_32 = arith.constant 0 : index
    %c0_33 = arith.constant 0 : index
    %43 = vector.load %arg8[%c0_32, %c0_33] : memref<64x1xf32, #tpu.memory_space<vmem>>, vector<64x1xf32>
    %44 = vector.broadcast %43 : vector<64x1xf32> to vector<64x256xf32>
    %45 = arith.addf %42, %44 : vector<64x256xf32>
    %46 = vector.extract_strided_slice %45 {offsets = [0, 0], sizes = [32, 128], strides = [1, 1]} : vector<64x256xf32> to vector<32x128xf32>
    %47 = vector.extract_strided_slice %45 {offsets = [32, 128], sizes = [32, 128], strides = [1, 1]} : vector<64x256xf32> to vector<32x128xf32>
    %48 = arith.mulf %46, %47 : vector<32x128xf32>
    %cst_34 = arith.constant dense<0.000000e+00> : vector<128xf32>
    %49 = vector.multi_reduction <add>, %48, %cst_34 [0] : vector<32x128xf32> to vector<128xf32>
    %50 = vector.shape_cast %49 : vector<128xf32> to vector<1x128xf32>
    %51 = arith.mulf %46, %12 : vector<32x128xf32>
    %cst_35 = arith.constant dense<0.000000e+00> : vector<128xf32>
    %52 = vector.multi_reduction <add>, %51, %cst_35 [0] : vector<32x128xf32> to vector<128xf32>
    %53 = vector.shape_cast %52 : vector<128xf32> to vector<1x128xf32>
    %54 = tpu.concatenate %50, %53 in 0 : vector<1x128xf32>, vector<1x128xf32> -> vector<2x128xf32>
    %c0_36 = arith.constant 0 : index
    %c0_37 = arith.constant 0 : index
    %55 = vector.load %arg9[%c0_36, %c0_37] : memref<2x128xf32, #tpu.memory_space<vmem>>, vector<2x128xf32>
    tpu.vector_store %arg9[%c0_36, %c0_37], %54 {strides = array<i32>} : memref<2x128xf32, #tpu.memory_space<vmem>>, vector<2x128xf32>,
    return
  }
  func.func @transform_0(%arg0: i32) -> (i32, i32) {
    %c0_i32 = arith.constant 0 : i32
    %c0_i32_0 = arith.constant 0 : i32
    return %c0_i32, %arg0 : i32, i32
  }
  func.func @transform_1(%arg0: i32) -> (i32, i32) {
    %c0_i32 = arith.constant 0 : i32
    %c0_i32_0 = arith.constant 0 : i32
    return %c0_i32, %arg0 : i32, i32
  }
  func.func @transform_2(%arg0: i32) -> (i32, i32) {
    %c0_i32 = arith.constant 0 : i32
    %c0_i32_0 = arith.constant 0 : i32
    return %c0_i32, %arg0 : i32, i32
  }
  func.func @transform_3(%arg0: i32) -> (i32, i32) {
    %c0_i32 = arith.constant 0 : i32
    %c0_i32_0 = arith.constant 0 : i32
    %c0_i32_1 = arith.constant 0 : i32
    return %c0_i32, %c0_i32_0 : i32, i32
  }
  func.func @transform_4(%arg0: i32) -> (i32, i32, i32) {
    %c0_i32 = arith.constant 0 : i32
    %c0_i32_0 = arith.constant 0 : i32
    %c0_i32_1 = arith.constant 0 : i32
    %c0_i32_2 = arith.constant 0 : i32
    return %c0_i32, %c0_i32_0, %c0_i32_1 : i32, i32, i32
  }
  func.func @transform_5(%arg0: i32) -> (i32, i32, i32) {
    %c0_i32 = arith.constant 0 : i32
    %c0_i32_0 = arith.constant 0 : i32
    %c0_i32_1 = arith.constant 0 : i32
    %c0_i32_2 = arith.constant 0 : i32
    return %c0_i32, %c0_i32_0, %c0_i32_1 : i32, i32, i32
  }
  func.func @transform_6(%arg0: i32) -> (i32, i32) {
    %c0_i32 = arith.constant 0 : i32
    %c0_i32_0 = arith.constant 0 : i32
    %c0_i32_1 = arith.constant 0 : i32
    return %c0_i32, %c0_i32_0 : i32, i32
  }
  func.func @transform_7(%arg0: i32) -> (i32, i32) {
    %c0_i32 = arith.constant 0 : i32
    %c0_i32_0 = arith.constant 0 : i32
    %c0_i32_1 = arith.constant 0 : i32
    return %c0_i32, %c0_i32_0 : i32, i32
  }
  func.func @transform_8(%arg0: i32) -> (i32, i32) {
    %c0_i32 = arith.constant 0 : i32
    %c0_i32_0 = arith.constant 0 : i32
    return %c0_i32, %arg0 : i32, i32
  }
}

</mosaic_0001>

<bundles_post_ra>
// kernel: ngcf_forward.1
= control target key start
LH: loop header
LB: loop body
LE: loop exit
PB: predicated region body
PF: predicated region fallthrough
CT: control target
= control target key end

     0   :  { %13 = vsyncpa [#allocation3], 0  ;;  %s1851_s27 = smov 0   ;;  %s2316_s0 = inlined_call_operand.vmem [shape: s32[1,256], index: 0, kind: input, shape index: {}]   ;;  %s2317_s1 = inlined_call_operand.vmem [shape: s32[1,256], index: 1, kind: input, shape index: {}]   ;;  %s2318_s2 = inlined_call_operand.vmem [shape: s32[1,256], index: 2, kind: input, shape index: {}]   ;;  %s2319_s3 = inlined_call_operand.vmem [shape: f32[32,160], index: 3, kind: input, shape index: {}]   ;;  %s2320_s4 = inlined_call_operand.vmem [shape: f32[3,32,32], index: 4, kind: input, shape index: {}]   ;;  %s2321_s5 = inlined_call_operand.vmem [shape: f32[3,32,1], index: 5, kind: input, shape index: {}]   ;;  %s2322_s6 = inlined_call_operand.hbm [shape: f32[64,128], index: 6, kind: input, shape index: {}]   ;;  %s2323_s7 = inlined_call_operand.vmem [shape: f32[64,1], index: 7, kind: input, shape index: {}]   ;;  %s2324_s8 = inlined_call_operand.vmem [shape: f32[2,256], index: 8, kind: output, shape index: {}]  }
   0x1 LB: > { %s1857_s28 = sadd.s32 4294967295, %s1797_s27   ;;  %p1439_p0 = scmp.ge.s32.totalorder %s1797_s27, 1  ;;  %s1797_s27 = sphi %s1851_s27, %s19_s27  }
   0x2   : > { %p233_p1 = scmp.lt.s32.totalorder %s1797_s27, 3  ;;  %s1799_s29 = smov [#allocation2]  }
   0x3   : > { %s254_s30 = sshll.u32 %s1799_s29, 4  ;;  %p2325_p3 = scmp.eq.s32.totalorder %s1857_s28, 0  ;;  %s255_s30 = int_to_ptr.vmem [resolvable:$true] %s254_s30 }
   0x4   : > { %p1861_p2 = pnand %p1439_p0, %p233_p1  ;;  %s1759_s13 = scalar_lea.hbm %s2322_s6, 1024 }
   0x5   : > { %p1760_p6 = scmp.ne.s32.totalorder %s2322_s6, %s1759_s13  ;;  %p1766_p10 = scmp.lt.u32.totalorder %s1759_s13, %s2322_s6 }
   0x6   : > { %s2327_s9 = scalar_select %p1861_p2, 1, 0 }
   0x7   : > { %p1736_p4 = pneg %p1861_p2 }
   0x9   : > { %p1870_p5 = pnand %p2325_p3, %p1736_p4 }
   0xb   : > { %p1761_p7 = pneg %p1870_p5 }
   0xd   : > { %p1762_p8 = pnand %p1761_p7, %p1760_p6 }
   0xf   : > { %p1763_p9 = pneg %p1762_p8 }
  0x11   : > { %p1768_p11 = pnand %p1766_p10, %p1763_p9 }
  0x13   : > { %1771 = shalt.err (!%p1768_p11)
}
  0x14   : > { %s1772_s18 = scalar_lea.vmem %s255_s30, 1024  ;;  %p1780_p1 = scmp.lt.s32.totalorder %s255_s30, %s255_s30 }
  0x15   : > { %p1773_p12 = scmp.ne.s32.totalorder %s255_s30, %s1772_s18  ;;  %p1781_p4 = scmp.lt.s32.totalorder %s1772_s18, %s1772_s18 }
  0x17   : > { %p1775_p13 = pnand %p1773_p12, %p1761_p7  ;;  %p1782_p3 = por %p1781_p4, %p1780_p1 }
  0x19   : > { %p1776_p0 = pneg %p1775_p13 }
  0x1b   : > { %p1783_p2 = pnand %p1782_p3, %p1776_p0 }
  0x1d   : > { %1786 = shalt.err (!%p1783_p2)
}
  0x1e   : > { %s1800_s19 = smov 128   ;;  %s1801_s20 = smov 8  }
  0x1f   : > { %1739 = dma.hbm_to_vmem [thread:$0]  (!%p1870_p5), %s2322_s6, 1024, %s255_s30, [#allocation3], %s1800_s19, %s1800_s19, %s1801_s20  }
  0x20   : > { %p2329_p6 = scmp.ne.s32.totalorder %s2327_s9, 0 }
  0x21   : > { %p2330_p8 = scmp.eq.s32.totalorder (!%p2329_p6), %s1857_s28, 0 }
  0x22   : > { %291 = sbr.rel (%p2329_p6) target bundleno = 1287 (0x507), region = 52 }
  0x29   : > { %1792 = dma.done.wait (%p2330_p8), [#allocation3], 1024   ;;  %p2331_p7 = pmov %p2330_p8 }
  0x2a   : > { %p328_p2 = scmp.lt.s32.totalorder %s1857_s28, 1  ;;  %v344_v0 = vlaneseq  ;;  %v1802_v2 = vmov 0.0|0.0   ;;  %vm565_vm0 = vcmask 261120   ;;  %v558_v10 = vld [vmem:[%s2319_s3 + $0x8] sm:$0xff]  ;;  %v1803_v11 = vmov 1.0|1.0  }
  0x2b   : > { %1794 = vsyncadd (%p2331_p7), [#allocation3], 4294966272  ;;  %1646 = vmatprep.subr.bf16.mxu1 %v1802_v2  ;;  %1548 = vmatprep.mubr.msk.f32.mxu0 %vm565_vm0, %v558_v10  ;;  %v557_v27 = vld [vmem:[%s2319_s3] sm:$0xff]  ;;  %v560_v28 = vld [vmem:[%s2319_s3 + $0x18] sm:$0xff]  ;;  %v1804_v34 = vmov 0.0   ;;  %v1805_v37 = vmov 0  }
  0x2c   : > { %s2333_s28 = smov (!%p328_p2, %s1857_s28), 1  ;;  %v1900_v1 = vshrl.u32 %v344_v0, 7  ;;  %1572 = vmatprep.mubr.msk.f32.mxu1 %vm565_vm0, %v558_v10  ;;  %v559_v29 = vld [vmem:[%s2319_s3 + $0x10] sm:$0xff]  ;;  %v562_v30 = vld [vmem:[%s2319_s3 + $0x28] sm:$0xff]  ;;  %v561_v31 = vld [vmem:[%s2319_s3 + $0x20] sm:$0xff]  ;;  %1757 = vset.pattern.permute.xlu0 %v1805_v37 }
  0x2d   : > { %s333_s25 = scalar_lea.vmem %s2317_s1, %s2333_s28  ;;  %s330_s30 = scalar_lea.vmem %s2316_s0, %s2333_s28  ;;  %v564_v32 = vld [vmem:[%s2319_s3 + $0x38] sm:$0xff]  ;;  %v563_v33 = vld [vmem:[%s2319_s3 + $0x30] sm:$0xff]  ;;  %v756_v35 = vld [vmem:[%s2321_s5] sm:$0xff]  ;;  %1758 = vset.pattern.permute.xlu1 %v1805_v37 }
  0x2e   : > { %v1908_v3 = vadd.s32 8, %v1900_v1  ;;  %v1915_v4 = vadd.s32 16, %v1900_v1  ;;  %v1918_v5 = vadd.s32 24, %v1900_v1  ;;  %v1921_v6 = vadd.s32 32, %v1900_v1  ;;  %v1926_v8 = vld [vmem:[%s333_s25] ss:$0 sm:$0xff]  ;;  %s336_s13 = scalar_lea.vmem %s2318_s2, %s2333_s28  ;;  %762 = vperm.xlu0 %1757, %v756_v35  }
  0x2f   : > { %v1924_v7 = vadd.s32 40, %v1900_v1  ;;  %v1928_v9 = vld [vmem:[%s330_s30] ss:$0 sm:$0xff]  ;;  %vm378_vm1 = vcmp.eq.s32.totalorder %v1900_v1, %v1926_v8  ;;  %v1956_v12 = vadd.s32 48, %v1900_v1  ;;  %v1959_v13 = vadd.s32 56, %v1900_v1  ;;  %v758_v36 = vld [vmem:[%s2321_s5 + $0x10] sm:$0xff] }
  0x30   : > { %vm381_vm2 = vcmp.eq.s32.totalorder %v1908_v3, %v1926_v8  ;;  %vm377_vm3 = vcmp.eq.s32.totalorder %v1900_v1, %v1928_v9  ;;  %vm380_vm4 = vcmp.eq.s32.totalorder %v1908_v3, %v1928_v9  ;;  %vm384_vm6 = vcmp.eq.s32.totalorder %v1915_v4, %v1926_v8  ;;  %v2015_v20 = vld [vmem:[%s336_s13] ss:$0 sm:$0xff]  ;;  %772 = vperm.xlu1 %1758, %v758_v36   ;;  %v757_v38 = vld [vmem:[%s2321_s5 + $0x8] sm:$0xff]  ;;  %v759_v39 = vld [vmem:[%s2321_s5 + $0x18] sm:$0xff]  ;;  %s1444_s12 = sshll.u32 %s2333_s28, 1 }
  0x31   : > { %vm1606_vm5 = vmpackc.low %vm381_vm2, %vm378_vm1  ;;  %vm387_vm7 = vcmp.eq.s32.totalorder %v1918_v5, %v1926_v8  ;;  %vm383_vm8 = vcmp.eq.s32.totalorder %v1915_v4, %v1928_v9  ;;  %vm386_vm9 = vcmp.eq.s32.totalorder %v1918_v5, %v1928_v9  ;;  %vm390_vm11 = vcmp.eq.s32.totalorder %v1921_v6, %v1926_v8  ;;  %v1584_v40 = vld [vmem:[%s2321_s5 + $0x20] sm:$0xff]  ;;  %v1585_v41 = vld [vmem:[%s2321_s5 + $0x28] sm:$0xff]  ;;  %s340_s15 = scalar_lea.vmem %s2324_s8, %s1444_s12 }
  0x32   : > { %1607 = vmatprep.subr.msk.bf16.mxu0 %vm1606_vm5, %v1803_v11  ;;  %vm1608_vm10 = vmpackc.low %vm380_vm4, %vm377_vm3  ;;  %vm393_vm12 = vcmp.eq.s32.totalorder %v1924_v7, %v1926_v8  ;;  %vm389_vm1 = vcmp.eq.s32.totalorder %v1921_v6, %v1928_v9  ;;  %vm392_vm2 = vcmp.eq.s32.totalorder %v1924_v7, %v1928_v9  ;;  %vm396_vm3 = vcmp.eq.s32.totalorder %v1956_v12, %v1926_v8  ;;  %v1586_v42 = vld [vmem:[%s2321_s5 + $0x30] sm:$0xff]  ;;  %v1587_v43 = vld [vmem:[%s2321_s5 + $0x38] sm:$0xff] }
  0x33   : > { %1609 = vmatpush1.bf16.msk.msra.mxu0 %vm1608_vm10, %v1803_v11  ;;  %vm1610_vm13 = vmpackc.low %vm387_vm7, %vm384_vm6  ;;  %vm399_vm4 = vcmp.eq.s32.totalorder %v1959_v13, %v1926_v8  ;;  %v1973_v14 = vadd.s32 64, %v1900_v1  ;;  %v1976_v15 = vadd.s32 72, %v1900_v1  ;;  %vm395_vm7 = vcmp.eq.s32.totalorder %v1956_v12, %v1928_v9  ;;  %767 = vperm.xlu0 %1757, %v757_v38   ;;  %v1596_v44 = vld [vmem:[%s2321_s5 + $0x40] sm:$0xff]  ;;  %v1597_v45 = vld [vmem:[%s2321_s5 + $0x48] sm:$0xff] }
  0x34   : > { %1611 = vmatprep.subr.msk.bf16.mxu0 %vm1610_vm13, %v1803_v11  ;;  %vm1612_vm14 = vmpackc.low %vm386_vm9, %vm383_vm8  ;;  %vm398_vm8 = vcmp.eq.s32.totalorder %v1959_v13, %v1928_v9  ;;  %v1989_v16 = vadd.s32 80, %v1900_v1  ;;  %v1992_v17 = vadd.s32 88, %v1900_v1  ;;  %v2005_v18 = vadd.s32 96, %v1900_v1  ;;  %777 = vperm.xlu1 %1758, %v759_v39   ;;  %v1598_v46 = vld [vmem:[%s2321_s5 + $0x50] sm:$0xff]  ;;  %v1599_v47 = vld [vmem:[%s2321_s5 + $0x58] sm:$0xff] }
  0x35   : > { %vm1614_vm15 = vmpackc.low %vm393_vm12, %vm390_vm11  ;;  %vm402_vm9 = vcmp.eq.s32.totalorder %v1973_v14, %v1926_v8  ;;  %vm405_vm10 = vcmp.eq.s32.totalorder %v1976_v15, %v1926_v8  ;;  %vm401_vm13 = vcmp.eq.s32.totalorder %v1973_v14, %v1928_v9  ;;  %v2008_v19 = vadd.s32 104, %v1900_v1  ;;  %v1175_v48 = vld [vmem:[%s2323_s7] sm:$0xff]  ;;  %v1176_v49 = vld [vmem:[%s2323_s7 + $0x8] sm:$0xff] }
  0x36   : > { %vm1616_vm5 = vmpackc.low %vm392_vm2, %vm389_vm1  ;;  %vm411_vm1 = vcmp.eq.s32.totalorder %v1992_v17, %v1926_v8  ;;  %v2027_v21 = vadd.s32 112, %v1900_v1  ;;  %v2030_v22 = vadd.s32 120, %v1900_v1  ;;  %v2051_v23 = vadd.s32 128, %v1900_v1  ;;  %v1179_v50 = vld [vmem:[%s2323_s7 + $0x20] sm:$0xff]  ;;  %v1180_v51 = vld [vmem:[%s2323_s7 + $0x28] sm:$0xff] }
  0x37   : > { %1613 = vmatpush1.bf16.msk.msra.mxu0 %vm1612_vm14, %v1803_v11  ;;  %vm1618_vm6 = vmpackc.low %vm399_vm4, %vm396_vm3  ;;  %vm404_vm14 = vcmp.eq.s32.totalorder %v1976_v15, %v1928_v9  ;;  %vm407_vm3 = vcmp.eq.s32.totalorder %v1989_v16, %v1928_v9  ;;  %vm410_vm4 = vcmp.eq.s32.totalorder %v1992_v17, %v1928_v9  ;;  %v2054_v24 = vadd.s32 136, %v1900_v1  ;;  %901 = vperm.xlu0 %1757, %v1584_v40   ;;  %v1177_v52 = vld [vmem:[%s2323_s7 + $0x10] sm:$0xff]  ;;  %v1178_v54 = vld [vmem:[%s2323_s7 + $0x18] sm:$0xff] }
  0x38   : > { %1615 = vmatprep.subr.msk.bf16.mxu0 %vm1614_vm15, %v1803_v11  ;;  %vm1620_vm11 = vmpackc.low %vm398_vm8, %vm395_vm7  ;;  %vm408_vm15 = vcmp.eq.s32.totalorder %v1989_v16, %v1926_v8  ;;  %vm417_vm7 = vcmp.eq.s32.totalorder %v2008_v19, %v1926_v8  ;;  %vm379_vm8 = vcmp.eq.s32.totalorder %v1900_v1, %v2015_v20  ;;  %v2073_v25 = vadd.s32 144, %v1900_v1  ;;  %906 = vperm.xlu1 %1758, %v1585_v41   ;;  %v1181_v53 = vld [vmem:[%s2323_s7 + $0x30] sm:$0xff]  ;;  %v1182_v55 = vld [vmem:[%s2323_s7 + $0x38] sm:$0xff] }
  0x39   : > { %vm1622_vm12 = vmpackc.low %vm405_vm10, %vm402_vm9  ;;  %vm382_vm9 = vcmp.eq.s32.totalorder %v1908_v3, %v2015_v20  ;;  %v2076_v26 = vadd.s32 152, %v1900_v1  ;;  %v1580_v41 = vld [vmem:[%s2320_s4 + $0x20] sm:$0xff] }
  0x3a   : > { %vm1624_vm2 = vmpackc.low %vm404_vm14, %vm401_vm13  ;;  %vm388_vm13 = vcmp.eq.s32.totalorder %v1918_v5, %v2015_v20  ;;  %vm413_vm14 = vcmp.eq.s32.totalorder %v2005_v18, %v1928_v9  ;;  %v753_v5 = vld [vmem:[%s2320_s4 + $0x8] sm:$0xff] }
  0x3b   : > { %1617 = vmatpush1.bf16.msk.msra.mxu0 %vm1616_vm5, %v1803_v11  ;;  %vm1626_vm5 = vmpackc.low %vm411_vm1, %vm408_vm15  ;;  %vm416_vm15 = vcmp.eq.s32.totalorder %v2008_v19, %v1928_v9  ;;  %911 = vperm.xlu0 %1757, %v1586_v42   ;;  %v1581_v42 = vld [vmem:[%s2320_s4 + $0x28] sm:$0xff] }
  0x3c   : > { %1619 = vmatprep.subr.msk.bf16.mxu0 %vm1618_vm6, %v1803_v11  ;;  %vm414_vm6 = vcmp.eq.s32.totalorder %v2005_v18, %v1926_v8  ;;  %vm1628_vm10 = vmpackc.low %vm410_vm4, %vm407_vm3  ;;  %vm423_vm3 = vcmp.eq.s32.totalorder %v2030_v22, %v1926_v8  ;;  %916 = vperm.xlu1 %1758, %v1587_v43   ;;  %v1582_v43 = vld [vmem:[%s2320_s4 + $0x30] sm:$0xff] }
  0x3d   : > { %vm1647_vm1 = vmpackc.low %vm382_vm9, %vm379_vm8  ;;  %vm419_vm9 = vcmp.eq.s32.totalorder %v2027_v21, %v1928_v9 }
  0x3e   : > { %1648 = vmatpush1.bf16.msk.msra.mxu1 %vm1647_vm1, %v1803_v11  ;;  %vm422_vm1 = vcmp.eq.s32.totalorder %v2030_v22, %v1928_v9 }
  0x3f   : > { %1621 = vmatpush1.bf16.msk.msra.mxu0 %vm1620_vm11, %v1803_v11  ;;  %vm1630_vm11 = vmpackc.low %vm417_vm7, %vm414_vm6  ;;  %1649 = vmatprep.subr.bf16.mxu1 %v1802_v2  ;;  %vm391_vm6 = vcmp.eq.s32.totalorder %v1921_v6, %v2015_v20  ;;  %vm394_vm7 = vcmp.eq.s32.totalorder %v1924_v7, %v2015_v20  ;;  %v754_v6 = vld [vmem:[%s2320_s4 + $0x10] sm:$0xff]  ;;  %v755_v7 = vld [vmem:[%s2320_s4 + $0x18] sm:$0xff] }
  0x40   : > { %1623 = vmatprep.subr.msk.bf16.mxu0 %vm1622_vm12, %v1803_v11  ;;  %vm385_vm12 = vcmp.eq.s32.totalorder %v1915_v4, %v2015_v20  ;;  %1040 = vperm.xlu0 %1757, %v1596_v44   ;;  %v752_v4 = vld [vmem:[%s2320_s4] sm:$0xff]  ;;  %v1583_v44 = vld [vmem:[%s2320_s4 + $0x38] sm:$0xff] }
  0x41   : > { %vm1650_vm4 = vmpackc.low %vm388_vm13, %vm385_vm12  ;;  %1045 = vperm.xlu1 %1758, %v1597_v45  }
  0x42   : > { %1651 = vmatpush1.bf16.msk.msra.mxu1 %vm1650_vm4, %v1803_v11  ;;  %vm1653_vm12 = vmpackc.low %vm394_vm7, %vm391_vm6  ;;  %vm428_vm4 = vcmp.eq.s32.totalorder %v2054_v24, %v1928_v9  ;;  %vm435_vm6 = vcmp.eq.s32.totalorder %v2076_v26, %v1926_v8 }
  0x43   : > { %1625 = vmatpush1.bf16.msk.msra.mxu0 %vm1624_vm2, %v1803_v11  ;;  %vm420_vm2 = vcmp.eq.s32.totalorder %v2027_v21, %v1926_v8  ;;  %1652 = vmatprep.subr.bf16.mxu1 %v1802_v2  ;;  %vm1636_vm13 = vmpackc.low %vm422_vm1, %vm419_vm9  ;;  %vm403_vm9 = vcmp.eq.s32.totalorder %v1973_v14, %v2015_v20  ;;  %vm406_vm1 = vcmp.eq.s32.totalorder %v1976_v15, %v2015_v20 }
  0x44   : > { %1627 = vmatprep.subr.msk.bf16.mxu0 %vm1626_vm5, %v1803_v11  ;;  %vm1632_vm5 = vmpackc.low %vm416_vm15, %vm413_vm14  ;;  %vm397_vm14 = vcmp.eq.s32.totalorder %v1956_v12, %v2015_v20  ;;  %vm400_vm15 = vcmp.eq.s32.totalorder %v1959_v13, %v2015_v20  ;;  %1050 = vperm.xlu0 %1757, %v1598_v46  }
  0x45   : > { %vm1634_vm8 = vmpackc.low %vm423_vm3, %vm420_vm2  ;;  %vm425_vm3 = vcmp.eq.s32.totalorder %v2051_v23, %v1928_v9  ;;  %1055 = vperm.xlu1 %1758, %v1599_v47  }
  0x46   : > { %1654 = vmatpush1.bf16.msk.msra.mxu1 %vm1653_vm12, %v1803_v11  ;;  %vm1656_vm7 = vmpackc.low %vm400_vm15, %vm397_vm14  ;;  %vm434_vm12 = vcmp.eq.s32.totalorder %v2076_v26, %v1928_v9  ;;  %vm409_vm15 = vcmp.eq.s32.totalorder %v1989_v16, %v2015_v20 }
  0x47   : > { %1629 = vmatpush1.bf16.msk.msra.mxu0 %vm1628_vm10, %v1803_v11  ;;  %vm426_vm10 = vcmp.eq.s32.totalorder %v2051_v23, %v1926_v8  ;;  %1655 = vmatprep.subr.bf16.mxu1 %v1802_v2 }
  0x48   : > { %1631 = vmatprep.subr.msk.bf16.mxu0 %vm1630_vm11, %v1803_v11  ;;  %vm429_vm11 = vcmp.eq.s32.totalorder %v2054_v24, %v1926_v8  ;;  %1185 = vperm.xlu0 %1757, %v1175_v48  }
  0x49   : > { %vm1638_vm2 = vmpackc.low %vm429_vm11, %vm426_vm10  ;;  %vm431_vm11 = vcmp.eq.s32.totalorder %v2073_v25, %v1928_v9  ;;  %1190 = vperm.xlu1 %1758, %v1176_v49  }
  0x4a   : > { %1657 = vmatpush1.bf16.msk.msra.mxu1 %vm1656_vm7, %v1803_v11  ;;  %vm1644_vm14 = vmpackc.low %vm434_vm12, %vm431_vm11  ;;  %vm421_vm7 = vcmp.eq.s32.totalorder %v2027_v21, %v2015_v20  ;;  %vm433_vm12 = vcmp.eq.s32.totalorder %v2073_v25, %v2015_v20 }
  0x4b   : > { %1633 = vmatpush1.bf16.msk.msra.mxu0 %vm1632_vm5, %v1803_v11  ;;  %vm432_vm5 = vcmp.eq.s32.totalorder %v2073_v25, %v1926_v8  ;;  %1658 = vmatprep.subr.bf16.mxu1 %v1802_v2 }
  0x4c   : > { %1635 = vmatprep.subr.msk.bf16.mxu0 %vm1634_vm8, %v1803_v11  ;;  %vm1640_vm8 = vmpackc.low %vm428_vm4, %vm425_vm3  ;;  %vm415_vm4 = vcmp.eq.s32.totalorder %v2005_v18, %v2015_v20  ;;  %1205 = vperm.xlu0 %1757, %v1179_v50  }
  0x4d   : > { %vm1642_vm10 = vmpackc.low %vm435_vm6, %vm432_vm5  ;;  %vm418_vm5 = vcmp.eq.s32.totalorder %v2008_v19, %v2015_v20  ;;  %1210 = vperm.xlu1 %1758, %v1180_v51  }
  0x4e   : > { %vm1665_vm6 = vmpackc.low %vm418_vm5, %vm415_vm4 }
  0x4f   : > { %1637 = vmatpush1.bf16.msk.msra.mxu0 %vm1636_vm13, %v1803_v11  ;;  %vm1659_vm13 = vmpackc.low %vm406_vm1, %vm403_vm9  ;;  %vm427_vm1 = vcmp.eq.s32.totalorder %v2051_v23, %v2015_v20 }
  0x50   : > { %1639 = vmatprep.subr.msk.bf16.mxu0 %vm1638_vm2, %v1803_v11  ;;  %vm412_vm2 = vcmp.eq.s32.totalorder %v1992_v17, %v2015_v20  ;;  %1660 = vmatpush1.bf16.msk.msra.mxu1 %vm1659_vm13, %v1803_v11  ;;  %vm436_vm13 = vcmp.eq.s32.totalorder %v2076_v26, %v2015_v20 }
  0x51   : > { %1661 = vmatprep.subr.bf16.mxu1 %v1802_v2  ;;  %vm1662_vm3 = vmpackc.low %vm412_vm2, %vm409_vm15  ;;  %1195 = vperm.xlu0 %1757, %v1177_v52  }
  0x52   : > { %1215 = vperm.xlu1 %1758, %v1181_v53  }
  0x53   : > { %1641 = vmatpush1.bf16.msk.msra.mxu0 %vm1640_vm8, %v1803_v11  ;;  %vm424_vm8 = vcmp.eq.s32.totalorder %v2030_v22, %v2015_v20 }
  0x54   : > { %1643 = vmatprep.subr.msk.bf16.mxu0 %vm1642_vm10, %v1803_v11  ;;  %1663 = vmatpush1.bf16.msk.msra.mxu1 %vm1662_vm3, %v1803_v11  ;;  %vm1668_vm9 = vmpackc.low %vm424_vm8, %vm421_vm7  ;;  %vm430_vm10 = vcmp.eq.s32.totalorder %v2054_v24, %v2015_v20 }
  0x55   : > { %1664 = vmatprep.subr.bf16.mxu1 %v1802_v2  ;;  %vm1671_vm11 = vmpackc.low %vm430_vm10, %vm427_vm1  ;;  %1200 = vperm.xlu0 %1757, %v1178_v54  }
  0x56   : > { %1220 = vperm.xlu1 %1758, %v1182_v55  }
  0x57   : > { %1645 = vmatpush1.bf16.msk.msra.mxu0 %vm1644_vm14, %v1803_v11  ;;  %vm1674_vm14 = vmpackc.low %vm436_vm13, %vm433_vm12 }
  0x58   : > { %1666 = vmatpush1.bf16.msk.msra.mxu1 %vm1665_vm6, %v1803_v11 }
  0x59   : > { %1667 = vmatprep.subr.bf16.mxu1 %v1802_v2 }
  0x5a   : > { %643 = vmatmul.mubr.f32.vlgmr.msra.gmra.mrb[0].mxu0 %v557_v27 }
  0x5b   : > { %1549 = vmatprep.mubr.msk.f32.mxu0 %vm565_vm0, %v560_v28 }
  0x5c   : > { %1669 = vmatpush1.bf16.msk.msra.mxu1 %vm1668_vm9, %v1803_v11 }
  0x5d   : > { %1670 = vmatprep.subr.bf16.mxu1 %v1802_v2 }
  0x5e   : > { %649 = vmatmul.mubr.f32.gmra.mrb[2].mxu0 %v559_v29 }
  0x5f   : > { %1550 = vmatprep.mubr.msk.f32.mxu0 %vm565_vm0, %v562_v30 }
  0x60   : > { %1672 = vmatpush1.bf16.msk.msra.mxu1 %vm1671_vm11, %v1803_v11 }
  0x61   : > { %1673 = vmatprep.subr.bf16.mxu1 %v1802_v2 }
  0x62   : > { %655 = vmatmul.mubr.f32.gmra.mrb[4].mxu0 %v561_v31 }
  0x63   : > { %1551 = vmatprep.mubr.msk.f32.mxu0 %vm565_vm0, %v564_v32 }
  0x64   : > { %1675 = vmatpush1.bf16.msk.msra.mxu1 %vm1674_vm14, %v1803_v11 }
  0x66   : > { %661 = vmatmul.mubr.f32.gmra.mrb[6].mxu0 %v563_v33 }
  0x67   : > { %732 = vmatmul.mubr.f32.vlgmr.msra.gmra.mrb[0].mxu1 %v557_v27  ;;  %856 = vmatprep.mubr.f32.mxu0 %v1804_v34 }
  0x68   : > { %1573 = vmatprep.mubr.msk.f32.mxu1 %vm565_vm0, %v560_v28 }
  0x6b   : > { %737 = vmatmul.mubr.f32.gmra.mrb[2].mxu1 %v559_v29 }
  0x6c   : > { %1574 = vmatprep.mubr.msk.f32.mxu1 %vm565_vm0, %v562_v30 }
  0x6f   : > { %742 = vmatmul.mubr.f32.gmra.mrb[4].mxu1 %v561_v31 }
  0x70   : > { %1575 = vmatprep.mubr.msk.f32.mxu1 %vm565_vm0, %v564_v32 }
  0x73   : > { %747 = vmatmul.mubr.f32.gmra.mrb[6].mxu1 %v563_v33 }
  0x74   : > { %1287 = vmatprep.mubr.f32.mxu1 %v1804_v34 }
  0xad   : > { %v763_v8 = vpop.permute.xlu0 %762 }
  0xaf   : > { %v773_v17 = vpop.permute.xlu1 %772 }
  0xb2   : > { %v768_v12 = vpop.permute.xlu0 %767 }
  0xb3   : > { %v778_v28 = vpop.permute.xlu1 %777 }
  0xb6   : > { %v902_v47 = vpop.permute.xlu0 %901 }
  0xb7   : > { %v907_v49 = vpop.permute.xlu1 %906 }
 0x12d   : > { %v644_v56 = vpop.f32.mrb[0].mxu0 }
 0x12e   : > { %v646_v57 = vpop.f32.mrb[1].mxu0 }
 0x131   : > { %v650_v58 = vpop.f32.mrb[2].mxu0 }
 0x132   : > { %v1678_v59 = vpack.c.bf16 %v650_v58, %v644_v56  ;;  %v652_v60 = vpop.f32.mrb[3].mxu0 }
 0x133   : > { %v1676_v61 = vpack.c.bf16 %v652_v60, %v646_v57 }
 0x135   : > { %v656_v62 = vpop.f32.mrb[4].mxu0  ;;  %1677 = vmatprep.subr.bf16.mxu0 %v1676_v61  ;;  %1701 = vmatprep.subr.bf16.mxu1 %v1676_v61 }
 0x136   : > { %v658_v63 = vpop.f32.mrb[5].mxu0  ;;  %1679 = vmatpush1.bf16.msra.mxu0 %v1678_v59  ;;  %1703 = vmatpush1.bf16.msra.mxu1 %v1678_v59 }
 0x139   : > { %v662_v0 = vpop.f32.mrb[6].mxu0 }
 0x13a   : > { %v1682_v1 = vpack.c.bf16 %v662_v0, %v656_v62  ;;  %v664_v2 = vpop.f32.mrb[7].mxu0  ;;  %v912_v62 = vpop.permute.xlu0 %911 }
 0x13b   : > { %v1680_v3 = vpack.c.bf16 %v664_v2, %v658_v63 }
 0x13d   : > { %1681 = vmatprep.subr.bf16.mxu0 %v1680_v3  ;;  %1705 = vmatprep.subr.bf16.mxu1 %v1680_v3 }
 0x13e   : > { %1683 = vmatpush1.bf16.msra.mxu0 %v1682_v1  ;;  %1707 = vmatpush1.bf16.msra.mxu1 %v1682_v1  ;;  %v917_v1 = vpop.permute.xlu1 %916 }
 0x141   : > { %1576 = vmatmul.mubr.msk.f32.vlgmr.msra.gmra.mrb[8].mxu0 %vm565_vm0, %v752_v4 }
 0x142   : > { %862 = vmatprep.mubr.f32.mxu0 %v1804_v34 }
 0x145   : > { %1577 = vmatmul.mubr.msk.f32.gmra.mrb[10].mxu0 %vm565_vm0, %v753_v5 }
 0x146   : > { %868 = vmatprep.mubr.f32.mxu0 %v1804_v34 }
 0x149   : > { %1578 = vmatmul.mubr.msk.f32.gmra.mrb[12].mxu0 %vm565_vm0, %v754_v6 }
 0x14a   : > { %874 = vmatprep.mubr.f32.mxu0 %v1804_v34 }
 0x14d   : > { %1579 = vmatmul.mubr.msk.f32.gmra.mrb[14].mxu0 %vm565_vm0, %v755_v7 }
 0x14e   : > { %995 = vmatprep.mubr.f32.mxu0 %v1804_v34 }
 0x214   : > { %v858_v9 = vpop.f32.mrb[8].mxu0 }
 0x215   : > { %v860_v10 = vpop.f32.mrb[9].mxu0  ;;  %v859_v11 = vadd.f32 %v858_v9, %v763_v8 }
 0x216   : > { %v861_v13 = vadd.f32 %v860_v10, %v763_v8 }
 0x217   : > { %v881_v19 = vmax.f32 %v859_v11, 0.0 }
 0x218   : > { %v864_v14 = vpop.f32.mrb[10].mxu0  ;;  %v882_v21 = vmax.f32 %v861_v13, 0.0  ;;  %v1592_v13 = vld [vmem:[%s2320_s4 + $0x40] sm:$0xff] }
 0x219   : > { %v865_v15 = vadd.f32 %v864_v14, %v768_v12  ;;  %v866_v16 = vpop.f32.mrb[11].mxu0  ;;  %v1593_v14 = vld [vmem:[%s2320_s4 + $0x48] sm:$0xff] }
 0x21a   : > { %v867_v18 = vadd.f32 %v866_v16, %v768_v12  ;;  %v1595_v16 = vld [vmem:[%s2320_s4 + $0x58] sm:$0xff] }
 0x21b   : > { %v883_v20 = vmax.f32 %v865_v15, 0.0  ;;  %v1594_v15 = vld [vmem:[%s2320_s4 + $0x50] sm:$0xff] }
 0x21c   : > { %v884_v22 = vmax.f32 %v867_v18, 0.0  ;;  %v870_v23 = vpop.f32.mrb[12].mxu0 }
 0x21d   : > { %v1686_v24 = vpack.c.bf16 %v883_v20, %v881_v19  ;;  %v872_v25 = vpop.f32.mrb[13].mxu0  ;;  %v871_v27 = vadd.f32 %v870_v23, %v773_v17 }
 0x21e   : > { %v1684_v26 = vpack.c.bf16 %v884_v22, %v882_v21  ;;  %v873_v29 = vadd.f32 %v872_v25, %v773_v17  ;;  %v2290_v17 = vpop.f32.mrb[0].mxu1 }
 0x21f   : > { %v885_v35 = vmax.f32 %v871_v27, 0.0  ;;  %v735_v18 = vpop.f32.mrb[1].mxu1  ;;  %v1041_v27 = vpop.permute.xlu0 %1040 }
 0x220   : > { %v876_v30 = vpop.f32.mrb[14].mxu0  ;;  %1685 = vmatprep.subr.bf16.mxu0 %v1684_v26  ;;  %1709 = vmatprep.subr.bf16.mxu1 %v1684_v26  ;;  %v886_v37 = vmax.f32 %v873_v29, 0.0  ;;  %v2292_v19 = vpop.f32.mrb[2].mxu1 }
 0x221   : > { %v877_v31 = vadd.f32 %v876_v30, %v778_v28  ;;  %v878_v32 = vpop.f32.mrb[15].mxu0  ;;  %1687 = vmatpush1.bf16.msra.mxu0 %v1686_v24  ;;  %1711 = vmatpush1.bf16.msra.mxu1 %v1686_v24  ;;  %v740_v20 = vpop.f32.mrb[3].mxu1 }
 0x222   : > { %v879_v33 = vadd.f32 %v878_v32, %v778_v28  ;;  %v2294_v21 = vpop.f32.mrb[4].mxu1  ;;  %v1046_v29 = vpop.permute.xlu1 %1045 }
 0x223   : > { %v887_v36 = vmax.f32 %v877_v31, 0.0  ;;  %v745_v22 = vpop.f32.mrb[5].mxu1 }
 0x224   : > { %v888_v38 = vmax.f32 %v879_v33, 0.0  ;;  %v2296_v23 = vpop.f32.mrb[6].mxu1 }
 0x225   : > { %v1690_v39 = vpack.c.bf16 %v887_v36, %v885_v35  ;;  %v750_v24 = vpop.f32.mrb[7].mxu1 }
 0x226   : > { %v1688_v40 = vpack.c.bf16 %v888_v38, %v886_v37 }
 0x228   : > { %1689 = vmatprep.subr.bf16.mxu0 %v1688_v40  ;;  %1713 = vmatprep.subr.bf16.mxu1 %v1688_v40 }
 0x229   : > { %1691 = vmatpush1.bf16.msra.mxu0 %v1690_v39  ;;  %1715 = vmatpush1.bf16.msra.mxu1 %v1690_v39 }
 0x22c   : > { %1588 = vmatmul.mubr.msk.f32.vlgmr.msra.gmra.mrb[16].mxu0 %vm565_vm0, %v1580_v41 }
 0x22d   : > { %1001 = vmatprep.mubr.f32.mxu0 %v1804_v34 }
 0x230   : > { %1589 = vmatmul.mubr.msk.f32.gmra.mrb[18].mxu0 %vm565_vm0, %v1581_v42 }
 0x231   : > { %1007 = vmatprep.mubr.f32.mxu0 %v1804_v34 }
 0x234   : > { %1590 = vmatmul.mubr.msk.f32.gmra.mrb[20].mxu0 %vm565_vm0, %v1582_v43  ;;  %v1051_v43 = vpop.permute.xlu0 %1050 }
 0x235   : > { %1013 = vmatprep.mubr.f32.mxu0 %v1804_v34 }
 0x238   : > { %1591 = vmatmul.mubr.msk.f32.gmra.mrb[22].mxu0 %vm565_vm0, %v1583_v44 }
 0x239   : > { %1134 = vmatprep.mubr.f32.mxu0 %v1804_v34 }
 0x2ff   : > { %v997_v45 = vpop.f32.mrb[16].mxu0 }
 0x300   : > { %v999_v46 = vpop.f32.mrb[17].mxu0  ;;  %v998_v48 = vadd.f32 %v997_v45, %v902_v47 }
 0x301   : > { %v1000_v50 = vadd.f32 %v999_v46, %v902_v47  ;;  %v1056_v46 = vpop.permute.xlu1 %1055 }
 0x302   : > { %v1020_v55 = vmax.f32 %v998_v48, 0.0 }
 0x303   : > { %v1003_v51 = vpop.f32.mrb[18].mxu0  ;;  %v1021_v57 = vmax.f32 %v1000_v50, 0.0 }
 0x304   : > { %v1004_v52 = vadd.f32 %v1003_v51, %v907_v49  ;;  %v1005_v53 = vpop.f32.mrb[19].mxu0 }
 0x305   : > { %v1006_v54 = vadd.f32 %v1005_v53, %v907_v49 }
 0x306   : > { %v1022_v56 = vmax.f32 %v1004_v52, 0.0 }
 0x307   : > { %v1023_v58 = vmax.f32 %v1006_v54, 0.0  ;;  %v1009_v59 = vpop.f32.mrb[20].mxu0 }
 0x308   : > { %v1694_v60 = vpack.c.bf16 %v1022_v56, %v1020_v55  ;;  %v1011_v61 = vpop.f32.mrb[21].mxu0  ;;  %v1010_v0 = vadd.f32 %v1009_v59, %v912_v62  ;;  %v1168_v59 = vld [vmem:[#allocation2 + $0x8] sm:$0xff] }
 0x309   : > { %v1692_v63 = vpack.c.bf16 %v1023_v58, %v1021_v57  ;;  %v1012_v2 = vadd.f32 %v1011_v61, %v912_v62  ;;  %v1167_v58 = vld [vmem:[#allocation2] sm:$0xff]  ;;  %v1170_v61 = vld [vmem:[#allocation2 + $0x18] sm:$0xff] }
 0x30a   : > { %v1024_v7 = vmax.f32 %v1010_v0, 0.0  ;;  %v1171_v62 = vld [vmem:[#allocation2 + $0x20] sm:$0xff]  ;;  %v1173_v0 = vld [vmem:[#allocation2 + $0x30] sm:$0xff] }
 0x30b   : > { %v1015_v3 = vpop.f32.mrb[22].mxu0  ;;  %1693 = vmatprep.subr.bf16.mxu0 %v1692_v63  ;;  %1717 = vmatprep.subr.bf16.mxu1 %v1692_v63  ;;  %v1025_v9 = vmax.f32 %v1012_v2, 0.0  ;;  %v1172_v63 = vld [vmem:[#allocation2 + $0x28] sm:$0xff]  ;;  %v1186_v2 = vpop.permute.xlu0 %1185 }
 0x30c   : > { %v1016_v4 = vadd.f32 %v1015_v3, %v917_v1  ;;  %v1017_v5 = vpop.f32.mrb[23].mxu0  ;;  %1695 = vmatpush1.bf16.msra.mxu0 %v1694_v60  ;;  %1719 = vmatpush1.bf16.msra.mxu1 %v1694_v60  ;;  %v1169_v60 = vld [vmem:[#allocation2 + $0x10] sm:$0xff] }
 0x30d   : > { %v1018_v6 = vadd.f32 %v1017_v5, %v917_v1  ;;  %v1174_v1 = vld [vmem:[#allocation2 + $0x38] sm:$0xff] }
 0x30e   : > { %v1026_v8 = vmax.f32 %v1016_v4, 0.0 }
 0x30f   : > { %v1027_v10 = vmax.f32 %v1018_v6, 0.0  ;;  %v1206_v3 = vpop.permute.xlu0 %1205 }
 0x310   : > { %v1698_v11 = vpack.c.bf16 %v1026_v8, %v1024_v7  ;;  %v1191_v8 = vpop.permute.xlu1 %1190 }
 0x311   : > { %v1696_v12 = vpack.c.bf16 %v1027_v10, %v1025_v9 }
 0x313   : > { %1697 = vmatprep.subr.bf16.mxu0 %v1696_v12  ;;  %1721 = vmatprep.subr.bf16.mxu1 %v1696_v12  ;;  %v1196_v12 = vpop.permute.xlu0 %1195 }
 0x314   : > { %1699 = vmatpush1.bf16.msra.mxu0 %v1698_v11  ;;  %1723 = vmatpush1.bf16.msra.mxu1 %v1698_v11 }
 0x317   : > { %1600 = vmatmul.mubr.msk.f32.vlgmr.msra.gmra.mrb[24].mxu0 %vm565_vm0, %v1592_v13  ;;  %v1201_v20 = vpop.permute.xlu0 %1200 }
 0x318   : > { %1140 = vmatprep.mubr.f32.mxu0 %v1804_v34 }
 0x31b   : > { %1601 = vmatmul.mubr.msk.f32.gmra.mrb[26].mxu0 %vm565_vm0, %v1593_v14 }
 0x31c   : > { %1146 = vmatprep.mubr.f32.mxu0 %v1804_v34 }
 0x31f   : > { %1602 = vmatmul.mubr.msk.f32.gmra.mrb[28].mxu0 %vm565_vm0, %v1594_v15 }
 0x320   : > { %1152 = vmatprep.mubr.f32.mxu0 %v1804_v34 }
 0x323   : > { %1603 = vmatmul.mubr.msk.f32.gmra.mrb[30].mxu0 %vm565_vm0, %v1595_v16  ;;  %vm1354_vm0 = vcmask 1040384  }
 0x3ea   : > { %v1136_v25 = vpop.f32.mrb[24].mxu0 }
 0x3eb   : > { %v1138_v26 = vpop.f32.mrb[25].mxu0  ;;  %v1137_v28 = vadd.f32 %v1136_v25, %v1041_v27 }
 0x3ec   : > { %v1139_v30 = vadd.f32 %v1138_v26, %v1041_v27 }
 0x3ed   : > { %v1159_v36 = vmax.f32 %v1137_v28, 0.0  ;;  %v1211_v28 = vpop.permute.xlu1 %1210 }
 0x3ee   : > { %v1142_v31 = vpop.f32.mrb[26].mxu0  ;;  %v1160_v38 = vmax.f32 %v1139_v30, 0.0 }
 0x3ef   : > { %v1143_v32 = vadd.f32 %v1142_v31, %v1046_v29  ;;  %v1144_v33 = vpop.f32.mrb[27].mxu0 }
 0x3f0   : > { %v1145_v35 = vadd.f32 %v1144_v33, %v1046_v29 }
 0x3f1   : > { %v1161_v37 = vmax.f32 %v1143_v32, 0.0 }
 0x3f2   : > { %v1162_v39 = vmax.f32 %v1145_v35, 0.0  ;;  %v1148_v40 = vpop.f32.mrb[28].mxu0 }
 0x3f3   : > { %v1726_v41 = vpack.c.bf16 %v1161_v37, %v1159_v36  ;;  %v1150_v42 = vpop.f32.mrb[29].mxu0  ;;  %v1149_v45 = vadd.f32 %v1148_v40, %v1051_v43  ;;  %v1216_v36 = vpop.permute.xlu1 %1215 }
 0x3f4   : > { %v1724_v44 = vpack.c.bf16 %v1162_v39, %v1160_v38  ;;  %v1151_v47 = vadd.f32 %v1150_v42, %v1051_v43 }
 0x3f5   : > { %v1163_v52 = vmax.f32 %v1149_v45, 0.0 }
 0x3f6   : > { %v1154_v48 = vpop.f32.mrb[30].mxu0  ;;  %1725 = vmatprep.subr.bf16.mxu1 %v1724_v44  ;;  %v1164_v54 = vmax.f32 %v1151_v47, 0.0 }
 0x3f7   : > { %v1155_v49 = vadd.f32 %v1154_v48, %v1056_v46  ;;  %v1156_v50 = vpop.f32.mrb[31].mxu0  ;;  %1727 = vmatpush1.bf16.msra.mxu1 %v1726_v41 }
 0x3f8   : > { %v1157_v51 = vadd.f32 %v1156_v50, %v1056_v46 }
 0x3f9   : > { %v1165_v53 = vmax.f32 %v1155_v49, 0.0 }
 0x3fa   : > { %v1166_v55 = vmax.f32 %v1157_v51, 0.0 }
 0x3fb   : > { %v1730_v56 = vpack.c.bf16 %v1165_v53, %v1163_v52 }
 0x3fc   : > { %v1728_v57 = vpack.c.bf16 %v1166_v55, %v1164_v54 }
 0x3fe   : > { %1729 = vmatprep.subr.bf16.mxu1 %v1728_v57 }
 0x3ff   : > { %1731 = vmatpush1.bf16.msra.mxu1 %v1730_v56 }
 0x402   : > { %1288 = vmatmul.mubr.f32.vlgmr.msra.gmra.mrb[8].mxu1 %v1167_v58 }
 0x403   : > { %1292 = vmatprep.mubr.f32.mxu1 %v1804_v34 }
 0x406   : > { %1293 = vmatmul.mubr.f32.gmra.mrb[10].mxu1 %v1168_v59 }
 0x407   : > { %1297 = vmatprep.mubr.f32.mxu1 %v1804_v34 }
 0x40a   : > { %1298 = vmatmul.mubr.f32.gmra.mrb[12].mxu1 %v1169_v60 }
 0x40b   : > { %1302 = vmatprep.mubr.f32.mxu1 %v1804_v34 }
 0x40e   : > { %1303 = vmatmul.mubr.f32.gmra.mrb[14].mxu1 %v1170_v61 }
 0x40f   : > { %1307 = vmatprep.mubr.f32.mxu1 %v1804_v34 }
 0x412   : > { %1308 = vmatmul.mubr.f32.gmra.mrb[16].mxu1 %v1171_v62 }
 0x413   : > { %1312 = vmatprep.mubr.f32.mxu1 %v1804_v34 }
 0x416   : > { %1313 = vmatmul.mubr.f32.gmra.mrb[18].mxu1 %v1172_v63 }
 0x417   : > { %1317 = vmatprep.mubr.f32.mxu1 %v1804_v34 }
 0x41a   : > { %1318 = vmatmul.mubr.f32.gmra.mrb[20].mxu1 %v1173_v0 }
 0x41b   : > { %1322 = vmatprep.mubr.f32.mxu1 %v1804_v34 }
 0x41e   : > { %1323 = vmatmul.mubr.f32.gmra.mrb[22].mxu1 %v1174_v1 }
 0x4d5   : > { %v1289_v4 = vpop.f32.mrb[8].mxu1 }
 0x4d6   : > { %v1290_v5 = vadd.f32 %v1289_v4, %v1186_v2  ;;  %v1291_v6 = vpop.f32.mrb[9].mxu1 }
 0x4d8   : > { %v1341_v7 = vmul.f32 %v1290_v5, %v2290_v17 }
 0x4d9   : > { %v1294_v9 = vpop.f32.mrb[10].mxu1 }
 0x4da   : > { %v1295_v10 = vadd.f32 %v1294_v9, %v1191_v8  ;;  %v1296_v11 = vpop.f32.mrb[11].mxu1 }
 0x4dc   : > { %v1342_v13 = vmul.f32 %v1295_v10, %v2292_v19 }
 0x4dd   : > { %v1299_v14 = vpop.f32.mrb[12].mxu1 }
 0x4de   : > { %v1345_v15 = vadd.f32 %v1342_v13, %v1341_v7  ;;  %v1300_v16 = vadd.f32 %v1299_v14, %v1196_v12  ;;  %v1301_v34 = vpop.f32.mrb[13].mxu1 }
 0x4e0   : > { %v1343_v18 = vmul.f32 %v1300_v16, %v2294_v21 }
 0x4e1   : > { %v1304_v22 = vpop.f32.mrb[14].mxu1 }
 0x4e2   : > { %v1346_v24 = vadd.f32 %v1345_v15, %v1343_v18  ;;  %v1305_v25 = vadd.f32 %v1304_v22, %v1201_v20  ;;  %v1306_v26 = vpop.f32.mrb[15].mxu1 }
 0x4e4   : > { %v1344_v17 = vmul.f32 %v1305_v25, %v2296_v23  ;;  %v1221_v23 = vpop.permute.xlu1 %1220 }
 0x4e5   : > { %v1309_v27 = vpop.f32.mrb[16].mxu1 }
 0x4e6   : > { %v1347_v29 = vadd.f32 %v1346_v24, %v1344_v17  ;;  %v1310_v30 = vpop.f32.mrb[17].mxu1 }
 0x4e7   : > { %v1311_v31 = vadd.f32 %v1310_v30, %v1206_v3 }
 0x4e8   : > { %v1348_v39 = vrot.slane %v1347_v29, 4 }
 0x4e9   : > { %v1328_v32 = vmul.f32 %v1311_v31, %v1290_v5  ;;  %v1314_v19 = vpop.f32.mrb[18].mxu1 }
 0x4ea   : > { %v1315_v33 = vpop.f32.mrb[19].mxu1  ;;  %v1349_v45 = vadd.f32 %v1348_v39, %v1347_v29 }
 0x4eb   : > { %v1316_v35 = vadd.f32 %v1315_v33, %v1211_v28 }
 0x4ec   : > { %v1350_v49 = vrot.slane %v1349_v45, 2 }
 0x4ed   : > { %v1329_v37 = vmul.f32 %v1316_v35, %v1295_v10  ;;  %v1319_v38 = vpop.f32.mrb[20].mxu1 }
 0x4ee   : > { %v1320_v21 = vpop.f32.mrb[21].mxu1  ;;  %v1351_v52 = vadd.f32 %v1350_v49, %v1349_v45 }
 0x4ef   : > { %v1332_v40 = vadd.f32 %v1329_v37, %v1328_v32  ;;  %v1321_v41 = vadd.f32 %v1320_v21, %v1216_v36 }
 0x4f0   : > { %v1352_v55 = vrot.slane %v1351_v52, 1 }
 0x4f1   : > { %v1330_v42 = vmul.f32 %v1321_v41, %v1300_v16  ;;  %v1324_v43 = vpop.f32.mrb[22].mxu1 }
 0x4f2   : > { %v1325_v44 = vpop.f32.mrb[23].mxu1  ;;  %v1353_v58 = vadd.f32 %v1352_v55, %v1351_v52 }
 0x4f3   : > { %v1333_v46 = vadd.f32 %v1332_v40, %v1330_v42  ;;  %v1326_v47 = vadd.f32 %v1325_v44, %v1221_v23 }
 0x4f5   : > { %v1331_v48 = vmul.f32 %v1326_v47, %v1305_v25 }
 0x4f7   : > { %v1334_v50 = vadd.f32 %v1333_v46, %v1331_v48 }
 0x4f9   : > { %v1335_v51 = vrot.slane %v1334_v50, 4 }
 0x4fb   : > { %v1336_v53 = vadd.f32 %v1335_v51, %v1334_v50 }
 0x4fd   : > { %v1337_v54 = vrot.slane %v1336_v53, 2 }
 0x4ff   : > { %v1338_v56 = vadd.f32 %v1337_v54, %v1336_v53 }
 0x501   : > { %v1339_v57 = vrot.slane %v1338_v56, 1 }
 0x503   : > { %v1340_v59 = vadd.f32 %v1339_v57, %v1338_v56 }
 0x505   : > { %v1355_v60 = vsel %vm1354_vm0, %v1340_v59, %v1353_v58 }
 0x506   : > { %1356 = vst [vmem:[%s340_s15] sm:$0x3] %v1355_v60 }
 0x507 PF: > { %s19_s27 = sadd.s32 1, %s1797_s27  }
 0x508   : > { %p16_p3 = scmp.ge.s32.totalorder %s19_s27, 4  }
 0x50a   :  { %18 = sbr.rel (!%p16_p3) target bundleno = 1 (0x1), region = 97 }
 0x511   :  { %1376 = vsyncpa [#allocation3], 1 }
 0x512   :  { %1378 = vsyncpa [#allocation3 + $0x1], 1 }

</bundles_post_ra>
